<compile_context>
chip_gen: v7x
topology: tpu7x:2x2x1
jax: 0.10.0
libtpu: 0.0.40
codegen_flags: <defaults>
</compile_context>

<pallas_src>
import functools

import jax
import jax.numpy as jnp
from jax.experimental import pallas as pl
from jax.experimental.pallas import tpu as pltpu


LANE = 128  # TPU lane width; hidden (VMEM-resident) feature dims are padded to this.


def _round_up(x, m):
    return (x + m - 1) // m * m


def _make_policy_kernel(n_layers):
    """Kernel for an MLP with `n_layers` hidden Tanh layers + linear head + rsample."""
    n_lin = n_layers + 1  # number of Linear layers

    def kernel(*refs):
        x_ref = refs[0]
        wb = refs[1:1 + 2 * n_lin]               # w0, b0, w1, b1, ..., w_out, b_out
        logstd_ref = refs[1 + 2 * n_lin]
        eps_ref = refs[2 + 2 * n_lin]
        out_ref = refs[3 + 2 * n_lin]

        cdt = x_ref.dtype                        # stream / MXU-operand dtype (bf16 or f32)

        # Hidden layers: Linear + Tanh.  Zero-padded weight rows/cols and biases give
        # tanh(0) = 0 in the padded hidden lanes, so padding never leaks into the result.
        h = x_ref[...]
        for l in range(n_layers):
            w = wb[2 * l][...]
            b = wb[2 * l + 1][...]
            # f32 accumulate on the MXU; tanh in f32 (no bf16 VPU/EUP on v5e); cast back so
            # the next matmul stays in native-bf16 MXU mode.
            z = jnp.dot(h, w, preferred_element_type=jnp.float32) + b.astype(jnp.float32)
            h = jnp.tanh(z).astype(cdt)

        # Output layer: mean of the action distribution.
        w = wb[2 * n_layers][...]
        b = wb[2 * n_layers + 1][...]
        mean = jnp.dot(h, w, preferred_element_type=jnp.float32) + b.astype(jnp.float32)

        # Normal(mean, exp(logstd)).rsample() == mean + exp(logstd) * eps
        std = jnp.exp(logstd_ref[...].astype(jnp.float32))
        out = mean + std * eps_ref[...].astype(jnp.float32)
        out_ref[...] = out.astype(out_ref.dtype)

    return kernel


def prepare_params(params, dtype=jnp.bfloat16):
    """Pad / cast the MLP parameters once (cache the result across forward calls).

    Hidden dims are padded to multiples of 128 (lane-dense, VMEM-resident only);
    the input (ob_dim) and output (ac_dim) dims are left at their natural size since
    those are the only dims that touch HBM streams.
    """
    layers, logstd = params
    n_layers = len(layers) - 1
    ob_dim = layers[0][0].shape[0]
    ac_dim = layers[-1][0].shape[1]

    dims = [ob_dim] + [w.shape[1] for (w, _) in layers]              # e.g. [16, 32, 32, 8]
    pdims = [dims[0]] + [_round_up(d, LANE) for d in dims[1:-1]] + [dims[-1]]

    wb = []
    for l, (w, b) in enumerate(layers):
        wp = jnp.pad(w.astype(jnp.float32),
                     ((0, pdims[l] - dims[l]), (0, pdims[l + 1] - dims[l + 1]))).astype(dtype)
        bp = jnp.pad(b.astype(jnp.float32).reshape(1, -1),
                     ((0, 0), (0, pdims[l + 1] - dims[l + 1]))).astype(dtype)
        wb += [wp, bp]

    logstd_p = logstd.astype(jnp.float32).reshape(1, -1)              # tiny; keep f32, exp in f32

    return {
        "wb": tuple(wb),
        "logstd": logstd_p,
        "pdims": tuple(pdims),
        "n_layers": n_layers,
        "ob_dim": ob_dim,
        "ac_dim": ac_dim,
        "dtype": jnp.dtype(dtype),
    }


def mlp_policy_forward(obs, prepared, *, eps=None, key=None, block_b=2048):
    """Sampled actions = MLP(obs) + exp(logstd) * eps via one Pallas call.

    If `eps` is None, the reparameterization noise is drawn with jax.random from `key`.
    `prepared` comes from prepare_params() (pre-padded / pre-cast weights).
    """
    wb = prepared["wb"]
    logstd_p = prepared["logstd"]
    pdims = prepared["pdims"]
    n_layers = prepared["n_layers"]
    ob_dim = prepared["ob_dim"]
    ac_dim = prepared["ac_dim"]
    sdt = prepared["dtype"]

    B = obs.shape[0]
    assert obs.shape[1] == ob_dim

    if eps is None:
        if key is None:
            raise ValueError("Pass either `eps` or a PRNG `key`.")
        eps = jax.random.normal(key, (B, ac_dim), jnp.float32)

    # Batch padding only to a sublane multiple; ragged last tile (if any) is masked.
    Bp = _round_up(B, 8)
    # Batch tile: large enough to amortize the ~0.35us/grid-step overhead, capped at
    # ceil(Bp/2) so we get >= 2 grid steps (both v7x TensorCores) whenever possible.
    # With bf16 streams a 2048-row tile is only ~100 KiB of double-buffered HBM traffic.
    TB = min(block_b, max(8, _round_up(pl.cdiv(Bp, 2), 8)))
    grid = (pl.cdiv(Bp, TB),)

    obs_s = obs.astype(sdt)
    eps_s = eps.astype(sdt)
    if Bp != B:
        obs_s = jnp.pad(obs_s, ((0, Bp - B), (0, 0)))
        eps_s = jnp.pad(eps_s, ((0, Bp - B), (0, 0)))

    # Batch-tiled (pipelined) streams: last dim == full array dim (exempt from 128 rule).
    def stream_spec(cols):
        return pl.BlockSpec((TB, cols), lambda i: (i, 0))

    # VMEM-resident operands (constant block index -> fetched once, stay resident).
    def resident_spec(shape):
        return pl.BlockSpec(shape, lambda i: (0, 0))

    in_specs = [stream_spec(ob_dim)]
    for l in range(n_layers + 1):
        in_specs.append(resident_spec(wb[2 * l].shape))       # W_l  (padded hidden dims)
        in_specs.append(resident_spec(wb[2 * l + 1].shape))   # b_l
    in_specs.append(resident_spec(logstd_p.shape))            # logstd
    in_specs.append(stream_spec(ac_dim))                      # eps

    # Advisory cost estimate for the XLA scheduler.
    itemsize = jnp.dtype(sdt).itemsize
    flops = 2 * Bp * sum(pdims[l] * pdims[l + 1] for l in range(n_layers + 1))
    transcendentals = Bp * sum(pdims[1:n_layers + 1]) + grid[0] * ac_dim
    weight_bytes = sum(int(w.size) * w.dtype.itemsize for w in wb) + logstd_p.size * 4
    stream_bytes = itemsize * Bp * (ob_dim + 2 * ac_dim)

    out = pl.pallas_call(
        _make_policy_kernel(n_layers),
        out_shape=jax.ShapeDtypeStruct((Bp, ac_dim), sdt),
        grid_spec=pltpu.PrefetchScalarGridSpec(
            num_scalar_prefetch=0,
            grid=grid,
            in_specs=in_specs,
            out_specs=stream_spec(ac_dim)),
        compiler_params=pltpu.CompilerParams(
            # Batch tiles are independent -> shard across TensorCores (v7x megacore).
            dimension_semantics=("parallel",)),
        cost_estimate=pl.CostEstimate(
            flops=flops,
            transcendentals=transcendentals,
            bytes_accessed=stream_bytes + weight_bytes),
    )(obs_s, *wb, logstd_p, eps_s)

    return out[:B] if Bp != B else out


def init_params(key, ob_dim, ac_dim, n_layers, size):
    """Deterministic init mimicking torch.nn.Linear defaults (U[-1/sqrt(fan_in), +])."""
    dims = [ob_dim] + [size] * n_layers + [ac_dim]
    keys = jax.random.split(key, 2 * (n_layers + 1))
    layers = []
    for l in range(n_layers + 1):
        fan_in, fan_out = dims[l], dims[l + 1]
        bound = 1.0 / (fan_in ** 0.5)
        w = jax.random.uniform(keys[2 * l], (fan_in, fan_out), jnp.float32, -bound, bound)
        b = jax.random.uniform(keys[2 * l + 1], (fan_out,), jnp.float32, -bound, bound)
        layers.append((w, b))
    logstd = jnp.zeros((ac_dim,), jnp.float32)   # nn.Parameter(torch.zeros(ac_dim))
    return layers, logstd


def reference_mean(obs, params):
    layers, _ = params
    h = obs
    for w, b in layers[:-1]:
        h = jnp.tanh(h @ w + b)
    w, b = layers[-1]
    return h @ w + b


def reference_forward(obs, params, eps):
    _, logstd = params
    return reference_mean(obs, params) + jnp.exp(logstd) * eps


# TODO(synk): the `update()` method (Adam step + MSE loss backward) is training-side and is
# not implemented here; only the forward (sampled actions) is kernelized.

if __name__ == "__main__":
    # Small shapes consistent with the module: ob_dim=16, ac_dim=8, n_layers=2, size=32.
    B, OB_DIM, AC_DIM, N_LAYERS, SIZE = 8, 16, 8, 2, 32

    key = jax.random.PRNGKey(0)
    k_obs, k_params, k_eps, k_sample, k_obs2, k_eps2 = jax.random.split(key, 6)

    obs = jax.random.normal(k_obs, (B, OB_DIM), jnp.float32)
    params = init_params(k_params, OB_DIM, AC_DIM, N_LAYERS, SIZE)
    eps = jax.random.normal(k_eps, (B, AC_DIM), jnp.float32)

    prepared_f32 = prepare_params(params, dtype=jnp.float32)    # exact-check path
    prepared_bf16 = prepare_params(params, dtype=jnp.bfloat16)  # production (bf16 streams)

    # 1) f32 streams, external eps -> tight check against the reference forward.
    actions = jax.block_until_ready(mlp_policy_forward(obs, prepared_f32, eps=eps))
    ref = reference_forward(obs, params, eps)
    assert actions.shape == (B, AC_DIM)
    assert jnp.allclose(actions, ref, atol=1e-4, rtol=1e-4)

    # 2) Production path: bf16 streams/weights, noise drawn in the wrapper from a key.
    sampled = jax.block_until_ready(
        mlp_policy_forward(obs, prepared_bf16, key=k_sample))
    assert sampled.shape == (B, AC_DIM)
    assert bool(jnp.all(jnp.isfinite(sampled.astype(jnp.float32))))
    # Same key/noise through the reference -> loose bf16 tolerance.
    eps_prod = jax.random.normal(k_sample, (B, AC_DIM), jnp.float32)
    ref_prod = reference_forward(obs, params, eps_prod)
    assert jnp.allclose(sampled.astype(jnp.float32), ref_prod, atol=1e-1, rtol=1e-1)

    # 3) Multi-tile grid with a small forced batch tile (exercises pipelined streams).
    B2 = 24
    obs2 = jax.random.normal(k_obs2, (B2, OB_DIM), jnp.float32)
    eps2 = jax.random.normal(k_eps2, (B2, AC_DIM), jnp.float32)
    actions2 = jax.block_until_ready(
        mlp_policy_forward(obs2, prepared_f32, eps=eps2, block_b=8))
    ref2 = reference_forward(obs2, params, eps2)
    assert actions2.shape == (B2, AC_DIM)
    assert jnp.allclose(actions2, ref2, atol=1e-4, rtol=1e-4)

    print("KERNEL_OK")
</pallas_src>

<mosaic_0001>
module attributes {stable_mosaic.version = 11 : i64} {
  func.func @kernel(%arg0: i32, %arg1: memref<8x16xf32, #tpu.memory_space<vmem>>, %arg2: memref<16x128xf32, #tpu.memory_space<vmem>>, %arg3: memref<1x128xf32, #tpu.memory_space<vmem>>, %arg4: memref<128x128xf32, #tpu.memory_space<vmem>>, %arg5: memref<1x128xf32, #tpu.memory_space<vmem>>, %arg6: memref<128x8xf32, #tpu.memory_space<vmem>>, %arg7: memref<1x8xf32, #tpu.memory_space<vmem>>, %arg8: memref<1x8xf32, #tpu.memory_space<vmem>>, %arg9: memref<8x8xf32, #tpu.memory_space<vmem>>, %arg10: memref<8x8xf32, #tpu.memory_space<vmem>>) attributes {dimension_semantics = [#tpu.dimension_semantics<parallel>], iteration_bounds = array<i64: 1>, scalar_prefetch = 0 : i64, scratch_operands = 0 : i64, tpu.core_type = #tpu.core_type<tc>, window_params = [{transform_indices = @transform_0, window_bounds = array<i64: 8, 16>}, {pipeline_mode = #tpu.pipeline_mode<synchronous>, transform_indices = @transform_1, window_bounds = array<i64: 16, 128>}, {pipeline_mode = #tpu.pipeline_mode<synchronous>, transform_indices = @transform_2, window_bounds = array<i64: 1, 128>}, {pipeline_mode = #tpu.pipeline_mode<synchronous>, transform_indices = @transform_3, window_bounds = array<i64: 128, 128>}, {pipeline_mode = #tpu.pipeline_mode<synchronous>, transform_indices = @transform_4, window_bounds = array<i64: 1, 128>}, {pipeline_mode = #tpu.pipeline_mode<synchronous>, transform_indices = @transform_5, window_bounds = array<i64: 128, 8>}, {pipeline_mode = #tpu.pipeline_mode<synchronous>, transform_indices = @transform_6, window_bounds = array<i64: 1, 8>}, {pipeline_mode = #tpu.pipeline_mode<synchronous>, transform_indices = @transform_7, window_bounds = array<i64: 1, 8>}, {transform_indices = @transform_8, window_bounds = array<i64: 8, 8>}, {transform_indices = @transform_9, window_bounds = array<i64: 8, 8>}]} {
    %c0 = arith.constant 0 : index
    %c0_0 = arith.constant 0 : index
    %0 = vector.load %arg1[%c0, %c0_0] : memref<8x16xf32, #tpu.memory_space<vmem>>, vector<8x16xf32>
    %c0_1 = arith.constant 0 : index
    %c0_2 = arith.constant 0 : index
    %1 = vector.load %arg2[%c0_1, %c0_2] : memref<16x128xf32, #tpu.memory_space<vmem>>, vector<16x128xf32>
    %c0_3 = arith.constant 0 : index
    %c0_4 = arith.constant 0 : index
    %2 = vector.load %arg3[%c0_3, %c0_4] : memref<1x128xf32, #tpu.memory_space<vmem>>, vector<1x128xf32>
    %cst = arith.constant dense<0.000000e+00> : vector<8x128xf32>
    %3 = tpu.matmul %0, %1, %cst {dimension_numbers = #tpu.dot_dimension_numbers<[1], [0], [0], [1], [0, 0, 1, 1], [], []>} : vector<8x16xf32>, vector<16x128xf32>, vector<8x128xf32> -> vector<8x128xf32>
    %4 = vector.broadcast %2 : vector<1x128xf32> to vector<8x128xf32>
    %5 = arith.addf %3, %4 : vector<8x128xf32>
    %6 = math.tanh %5 : vector<8x128xf32>
    %c0_5 = arith.constant 0 : index
    %c0_6 = arith.constant 0 : index
    %7 = vector.load %arg4[%c0_5, %c0_6] : memref<128x128xf32, #tpu.memory_space<vmem>>, vector<128x128xf32>
    %c0_7 = arith.constant 0 : index
    %c0_8 = arith.constant 0 : index
    %8 = vector.load %arg5[%c0_7, %c0_8] : memref<1x128xf32, #tpu.memory_space<vmem>>, vector<1x128xf32>
    %cst_9 = arith.constant dense<0.000000e+00> : vector<8x128xf32>
    %9 = tpu.matmul %6, %7, %cst_9 {dimension_numbers = #tpu.dot_dimension_numbers<[1], [0], [0], [1], [0, 0, 1, 1], [], []>} : vector<8x128xf32>, vector<128x128xf32>, vector<8x128xf32> -> vector<8x128xf32>
    %10 = vector.broadcast %8 : vector<1x128xf32> to vector<8x128xf32>
    %11 = arith.addf %9, %10 : vector<8x128xf32>
    %12 = math.tanh %11 : vector<8x128xf32>
    %c0_10 = arith.constant 0 : index
    %c0_11 = arith.constant 0 : index
    %13 = vector.load %arg6[%c0_10, %c0_11] : memref<128x8xf32, #tpu.memory_space<vmem>>, vector<128x8xf32>
    %c0_12 = arith.constant 0 : index
    %c0_13 = arith.constant 0 : index
    %14 = vector.load %arg7[%c0_12, %c0_13] : memref<1x8xf32, #tpu.memory_space<vmem>>, vector<1x8xf32>
    %cst_14 = arith.constant dense<0.000000e+00> : vector<8x8xf32>
    %15 = tpu.matmul %12, %13, %cst_14 {dimension_numbers = #tpu.dot_dimension_numbers<[1], [0], [0], [1], [0, 0, 1, 1], [], []>} : vector<8x128xf32>, vector<128x8xf32>, vector<8x8xf32> -> vector<8x8xf32>
    %16 = vector.broadcast %14 : vector<1x8xf32> to vector<8x8xf32>
    %17 = arith.addf %15, %16 : vector<8x8xf32>
    %c0_15 = arith.constant 0 : index
    %c0_16 = arith.constant 0 : index
    %18 = vector.load %arg8[%c0_15, %c0_16] : memref<1x8xf32, #tpu.memory_space<vmem>>, vector<1x8xf32>
    %19 = math.exp %18 : vector<1x8xf32>
    %c0_17 = arith.constant 0 : index
    %c0_18 = arith.constant 0 : index
    %20 = vector.load %arg9[%c0_17, %c0_18] : memref<8x8xf32, #tpu.memory_space<vmem>>, vector<8x8xf32>
    %21 = vector.broadcast %19 : vector<1x8xf32> to vector<8x8xf32>
    %22 = arith.mulf %21, %20 : vector<8x8xf32>
    %23 = arith.addf %17, %22 : vector<8x8xf32>
    %c0_19 = arith.constant 0 : index
    %c0_20 = arith.constant 0 : index
    %24 = vector.load %arg10[%c0_19, %c0_20] : memref<8x8xf32, #tpu.memory_space<vmem>>, vector<8x8xf32>
    tpu.vector_store %arg10[%c0_19, %c0_20], %23 {strides = array<i32>} : memref<8x8xf32, #tpu.memory_space<vmem>>, vector<8x8xf32>,
    return
  }
  func.func @transform_0(%arg0: i32) -> (i32, i32) {
    %c0_i32 = arith.constant 0 : i32
    %c0_i32_0 = arith.constant 0 : i32
    return %arg0, %c0_i32 : i32, i32
  }
  func.func @transform_1(%arg0: i32) -> (i32, i32) {
    %c0_i32 = arith.constant 0 : i32
    %c0_i32_0 = arith.constant 0 : i32
    %c0_i32_1 = arith.constant 0 : i32
    return %c0_i32, %c0_i32_0 : i32, i32
  }
  func.func @transform_2(%arg0: i32) -> (i32, i32) {
    %c0_i32 = arith.constant 0 : i32
    %c0_i32_0 = arith.constant 0 : i32
    %c0_i32_1 = arith.constant 0 : i32
    return %c0_i32, %c0_i32_0 : i32, i32
  }
  func.func @transform_3(%arg0: i32) -> (i32, i32) {
    %c0_i32 = arith.constant 0 : i32
    %c0_i32_0 = arith.constant 0 : i32
    %c0_i32_1 = arith.constant 0 : i32
    return %c0_i32, %c0_i32_0 : i32, i32
  }
  func.func @transform_4(%arg0: i32) -> (i32, i32) {
    %c0_i32 = arith.constant 0 : i32
    %c0_i32_0 = arith.constant 0 : i32
    %c0_i32_1 = arith.constant 0 : i32
    return %c0_i32, %c0_i32_0 : i32, i32
  }
  func.func @transform_5(%arg0: i32) -> (i32, i32) {
    %c0_i32 = arith.constant 0 : i32
    %c0_i32_0 = arith.constant 0 : i32
    %c0_i32_1 = arith.constant 0 : i32
    return %c0_i32, %c0_i32_0 : i32, i32
  }
  func.func @transform_6(%arg0: i32) -> (i32, i32) {
    %c0_i32 = arith.constant 0 : i32
    %c0_i32_0 = arith.constant 0 : i32
    %c0_i32_1 = arith.constant 0 : i32
    return %c0_i32, %c0_i32_0 : i32, i32
  }
  func.func @transform_7(%arg0: i32) -> (i32, i32) {
    %c0_i32 = arith.constant 0 : i32
    %c0_i32_0 = arith.constant 0 : i32
    %c0_i32_1 = arith.constant 0 : i32
    return %c0_i32, %c0_i32_0 : i32, i32
  }
  func.func @transform_8(%arg0: i32) -> (i32, i32) {
    %c0_i32 = arith.constant 0 : i32
    %c0_i32_0 = arith.constant 0 : i32
    return %arg0, %c0_i32 : i32, i32
  }
  func.func @transform_9(%arg0: i32) -> (i32, i32) {
    %c0_i32 = arith.constant 0 : i32
    %c0_i32_0 = arith.constant 0 : i32
    return %arg0, %c0_i32 : i32, i32
  }
}

</mosaic_0001>

<bundles_post_ra>
// kernel: tpu_custom_call.1
= control target key start
LH: loop header
LB: loop body
LE: loop exit
PB: predicated region body
PF: predicated region fallthrough
CT: control target
= control target key end

     0   :  { %14 = vsyncpa [#allocation3], 0  ;;  %s882_s0 = inlined_call_operand.hbm [shape: f32[8,16], index: 0, kind: input, shape index: {}]   ;;  %s883_s1 = inlined_call_operand.vmem [shape: f32[16,128], index: 1, kind: input, shape index: {}]   ;;  %s884_s2 = inlined_call_operand.vmem [shape: f32[1,128], index: 2, kind: input, shape index: {}]   ;;  %s885_s3 = inlined_call_operand.vmem [shape: f32[128,128], index: 3, kind: input, shape index: {}]   ;;  %s886_s4 = inlined_call_operand.vmem [shape: f32[1,128], index: 4, kind: input, shape index: {}]   ;;  %s887_s5 = inlined_call_operand.vmem [shape: f32[128,8], index: 5, kind: input, shape index: {}]   ;;  %s888_s6 = inlined_call_operand.hbm [shape: f32[1,8], index: 6, kind: input, shape index: {}]   ;;  %s889_s7 = inlined_call_operand.hbm [shape: f32[1,8], index: 7, kind: input, shape index: {}]   ;;  %s890_s8 = inlined_call_operand.vmem [shape: f32[8,8], index: 8, kind: input, shape index: {}]   ;;  %s891_s9 = inlined_call_operand.hbm [shape: f32[8,8], index: 9, kind: output, shape index: {}]  }
   0x1   :  { %15 = vsyncpa [#allocation6], 0 }
   0x2   :  { %16 = vsyncpa [#allocation4], 0  ;;  %s646_s30 = smov [#allocation5]   ;;  %s647_s11 = smov [#allocation2]  }
   0x3   :  { %s43_s10 = sshll.u32 %s646_s30, 4  ;;  %s23_s12 = sshll.u32 %s647_s11, 4  ;;  %s44_s10 = int_to_ptr.vmem [resolvable:$true] %s43_s10  ;;  %s24_s12 = int_to_ptr.vmem [resolvable:$true] %s23_s12 }
   0x4   :  { %s552_s15 = scalar_lea.hbm %s888_s6, 16 }
   0x5   :  { %p553_p0 = scmp.ne.s32.totalorder %s888_s6, %s552_s15  ;;  %p556_p1 = scmp.lt.u32.totalorder %s552_s15, %s888_s6 }
   0x7   :  { %p558_p2 = pnand %p556_p1, %p553_p0 }
   0x9   :  { %561 = shalt.err (!%p558_p2)
}
   0xa   :  { %s562_s20 = scalar_lea.vmem %s44_s10, 16  ;;  %s566_s21 = scalar_lea.vmem %s44_s10, 32 }
   0xb   :  { %p563_p3 = scmp.ne.s32.totalorder %s44_s10, %s562_s20  ;;  %p567_p4 = scmp.lt.s32.totalorder %s44_s10, %s44_s10 }
   0xc   :  { %p568_p5 = scmp.lt.s32.totalorder %s566_s21, %s562_s20 }
   0xe   :  { %p569_p6 = por %p568_p5, %p567_p4 }
  0x10   :  { %p570_p7 = pnand %p569_p6, %p563_p3 }
  0x12   :  { %573 = shalt.err (!%p570_p7)
}
  0x13   :  { %46 = dma.hbm_to_vmem [thread:$0]  %s888_s6, 16, %s44_s10, [#allocation6]  }
  0x14   :  { %s574_s26 = scalar_lea.hbm %s882_s0, 128 }
  0x15   :  { %p575_p8 = scmp.ne.s32.totalorder %s882_s0, %s574_s26  ;;  %p578_p9 = scmp.lt.u32.totalorder %s574_s26, %s882_s0 }
  0x17   :  { %p580_p10 = pnand %p578_p9, %p575_p8 }
  0x19   :  { %583 = shalt.err (!%p580_p10)
}
  0x1a   :  { %s584_s11 = scalar_lea.vmem %s24_s12, 128  ;;  %p589_p12 = scmp.lt.s32.totalorder %s24_s12, %s24_s12 }
  0x1b   :  { %p585_p11 = scmp.ne.s32.totalorder %s24_s12, %s584_s11  ;;  %p590_p13 = scmp.lt.s32.totalorder %s584_s11, %s584_s11 }
  0x1d   :  { %p591_p0 = por %p590_p13, %p589_p12 }
  0x1f   :  { %p592_p1 = pnand %p591_p0, %p585_p11 }
  0x21   :  { %595 = shalt.err (!%p592_p1)
}
  0x22   :  { %26 = dma.hbm_to_vmem [thread:$0]  %s882_s0, 128, %s24_s12, [#allocation3]  }
  0x23   :  { %s648_s13 = smov [#allocation7]   ;;  %s596_s17 = scalar_lea.hbm %s889_s7, 16 }
  0x24   :  { %s53_s14 = sshll.u32 %s648_s13, 4  ;;  %p597_p2 = scmp.ne.s32.totalorder %s889_s7, %s596_s17  ;;  %s54_s14 = int_to_ptr.vmem [resolvable:$true] %s53_s14 }
  0x25   :  { %p600_p3 = scmp.lt.u32.totalorder %s596_s17, %s889_s7 }
  0x27   :  { %p602_p4 = pnand %p600_p3, %p597_p2 }
  0x29   :  { %605 = shalt.err (!%p602_p4)
}
  0x2a   :  { %s606_s22 = scalar_lea.vmem %s54_s14, 16  ;;  %s610_s0 = scalar_lea.vmem %s54_s14, 32 }
  0x2b   :  { %p607_p5 = scmp.ne.s32.totalorder %s54_s14, %s606_s22  ;;  %p611_p6 = scmp.lt.s32.totalorder %s54_s14, %s54_s14 }
  0x2c   :  { %p612_p7 = scmp.lt.s32.totalorder %s610_s0, %s606_s22 }
  0x2e   :  { %p613_p8 = por %p612_p7, %p611_p6 }
  0x30   :  { %p614_p9 = pnand %p613_p8, %p607_p5 }
  0x32   :  { %617 = shalt.err (!%p614_p9)
}
  0x33   :  { %56 = dma.hbm_to_vmem [thread:$0]  %s889_s7, 16, %s54_s14, [#allocation6]  }
  0x34   :  { %640 = dma.done.wait [#allocation3], 128  }
  0x35   :  { %641 = vsyncadd [#allocation3], 4294967168 }
  0x36   :  { %642 = dma.done.wait [#allocation6], 32  }
  0x37   :  { %643 = vsyncadd [#allocation6], 4294967264  ;;  %v649_v0 = vmov 0.0|0.0   ;;  %vm650_vm0 = vmmov 0   ;;  %v651_v1 = vmov 0.0   ;;  %v69_v2 = vld [vmem:[%s883_s1] sm:$0xff] }
  0x38   :  { %488 = vmatprep.subr.bf16.mxu0 %v649_v0  ;;  %415 = vmatprep.mubr.msk.f32.mxu0 %vm650_vm0, %v651_v1  ;;  %v70_v3 = vld [vmem:[%s883_s1 + $0x8] sm:$0xff]  ;;  %v153_v5 = vld [vmem:[%s885_s3] sm:$0xff]  ;;  %v155_v7 = vld [vmem:[%s885_s3 + $0x10] sm:$0xff]  ;;  %vm78_vm1 = vcmask 130048   ;;  %vm352_vm2 = vcmask 64512  }
  0x39   :  { %491 = vmatprep.subr.bf16.mxu1 %v649_v0  ;;  %450 = vmatprep.mubr.msk.f32.mxu1 %vm650_vm0, %v651_v1  ;;  %v489_v4 = vpack.c.bf16 %v70_v3, %v69_v2  ;;  %v154_v6 = vld [vmem:[%s885_s3 + $0x8] sm:$0xff]  ;;  %v156_v9 = vld [vmem:[%s885_s3 + $0x18] sm:$0xff]  ;;  %v68_v10 = vld [vmem:[#allocation2] sm:$0xff]  ;;  %v345_v3 = vlaneseq }
  0x3a   :  { %v492_v8 = vpack.c.bf16 %v154_v6, %v153_v5  ;;  %v495_v11 = vpack.c.bf16 %v156_v9, %v155_v7  ;;  %v157_v12 = vld [vmem:[%s885_s3 + $0x20] sm:$0xff]  ;;  %v158_v13 = vld [vmem:[%s885_s3 + $0x28] sm:$0xff]  ;;  %v159_v15 = vld [vmem:[%s885_s3 + $0x30] sm:$0xff] }
  0x3b   :  { %490 = vmatpush3.bf16.msra.mxu0 %v489_v4  ;;  %v498_v14 = vpack.c.bf16 %v158_v13, %v157_v12  ;;  %v160_v16 = vld [vmem:[%s885_s3 + $0x38] sm:$0xff]  ;;  %v161_v18 = vld [vmem:[%s885_s3 + $0x40] sm:$0xff]  ;;  %v162_v19 = vld [vmem:[%s885_s3 + $0x48] sm:$0xff]  ;;  %v346_v4 = vshrl.u32 %v345_v3, 7 }
  0x3c   :  { %493 = vmatpush3.bf16.msra.mxu1 %v492_v8  ;;  %515 = vmatprep.subr.bf16.mxu0 %v649_v0  ;;  %v501_v17 = vpack.c.bf16 %v160_v16, %v159_v15  ;;  %v504_v20 = vpack.c.bf16 %v162_v19, %v161_v18  ;;  %v163_v21 = vld [vmem:[%s885_s3 + $0x50] sm:$0xff]  ;;  %v164_v22 = vld [vmem:[%s885_s3 + $0x58] sm:$0xff]  ;;  %v165_v24 = vld [vmem:[%s885_s3 + $0x60] sm:$0xff] }
  0x3d   :  { %494 = vmatprep.subr.bf16.mxu1 %v649_v0  ;;  %v507_v23 = vpack.c.bf16 %v164_v22, %v163_v21  ;;  %v166_v25 = vld [vmem:[%s885_s3 + $0x68] sm:$0xff]  ;;  %v167_v27 = vld [vmem:[%s885_s3 + $0x70] sm:$0xff]  ;;  %v168_v28 = vld [vmem:[%s885_s3 + $0x78] sm:$0xff]  ;;  %v347_v5 = vsub.s32 0, %v346_v4 }
  0x3e   :  { %416 = vmatmul.mubr.msk.f32.vlgmr.msra.gmra.mrb[0].mxu0 %vm78_vm1, %v68_v10  ;;  %v510_v26 = vpack.c.bf16 %v166_v25, %v165_v24  ;;  %v513_v29 = vpack.c.bf16 %v168_v28, %v167_v27  ;;  %v247_v30 = vld [vmem:[%s887_s5] sm:$0xff]  ;;  %v248_v31 = vld [vmem:[%s887_s5 + $0x8] sm:$0xff]  ;;  %v249_v32 = vld [vmem:[%s887_s5 + $0x10] sm:$0xff] }
  0x3f   :  { %485 = vmatprep.mubr.msk.f32.mxu0 %vm650_vm0, %v651_v1  ;;  %v516_v33 = vpack.c.bf16 %v248_v31, %v247_v30  ;;  %v250_v34 = vld [vmem:[%s887_s5 + $0x18] sm:$0xff]  ;;  %v251_v36 = vld [vmem:[%s887_s5 + $0x20] sm:$0xff]  ;;  %v252_v37 = vld [vmem:[%s887_s5 + $0x28] sm:$0xff] }
  0x40   :  { %496 = vmatpush3.bf16.msra.mxu1 %v495_v11  ;;  %v519_v35 = vpack.c.bf16 %v250_v34, %v249_v32  ;;  %v522_v38 = vpack.c.bf16 %v252_v37, %v251_v36  ;;  %v253_v39 = vld [vmem:[%s887_s5 + $0x30] sm:$0xff]  ;;  %v254_v40 = vld [vmem:[%s887_s5 + $0x38] sm:$0xff]  ;;  %v255_v42 = vld [vmem:[%s887_s5 + $0x40] sm:$0xff] }
  0x41   :  { %497 = vmatprep.subr.bf16.mxu1 %v649_v0  ;;  %517 = vmatpush3.bf16.msra.mxu0 %v516_v33  ;;  %v525_v41 = vpack.c.bf16 %v254_v40, %v253_v39  ;;  %v256_v43 = vld [vmem:[%s887_s5 + $0x48] sm:$0xff]  ;;  %v370_v45 = vld [vmem:[%s884_s2] ss:$0 sm:$0xff]  ;;  %v257_v50 = vld [vmem:[%s887_s5 + $0x50] sm:$0xff] }
  0x42   :  { %518 = vmatprep.subr.bf16.mxu0 %v649_v0  ;;  %v528_v44 = vpack.c.bf16 %v256_v43, %v255_v42  ;;  %v258_v51 = vld [vmem:[%s887_s5 + $0x58] sm:$0xff]  ;;  %v259_v53 = vld [vmem:[%s887_s5 + $0x60] sm:$0xff]  ;;  %v260_v54 = vld [vmem:[%s887_s5 + $0x68] sm:$0xff] }
  0x43   :  { %v531_v52 = vpack.c.bf16 %v258_v51, %v257_v50  ;;  %v534_v55 = vpack.c.bf16 %v260_v54, %v259_v53  ;;  %v261_v56 = vld [vmem:[%s887_s5 + $0x70] sm:$0xff]  ;;  %v262_v57 = vld [vmem:[%s887_s5 + $0x78] sm:$0xff]  ;;  %v372_v59 = vld [vmem:[%s886_s4] ss:$0 sm:$0xff]  ;;  %s652_s4 = smov [#allocation8]  }
  0x44   :  { %499 = vmatpush3.bf16.msra.mxu1 %v498_v14  ;;  %v537_v58 = vpack.c.bf16 %v262_v57, %v261_v56  ;;  %v340_v1 = vld [vmem:[#allocation7] sm:$0x1]  ;;  %v373_v8 = vld [vmem:[#allocation5] ss:$0 sm:$0xff]  ;;  %s360_s21 = sshll.u32 %s652_s4, 4  ;;  %s361_s21 = int_to_ptr.vmem [resolvable:$true] %s360_s21 }
  0x45   :  { %500 = vmatprep.subr.bf16.mxu1 %v649_v0  ;;  %520 = vmatpush3.bf16.msra.mxu0 %v519_v35  ;;  %v341_v2 = vmul.f32 1.442695, %v340_v1  ;;  %s618_s22 = scalar_lea.vmem %s361_s21, 128  ;;  %p623_p11 = scmp.lt.s32.totalorder %s361_s21, %s361_s21 }
  0x46   :  { %521 = vmatprep.subr.bf16.mxu0 %v649_v0  ;;  %p619_p10 = scmp.ne.s32.totalorder %s361_s21, %s618_s22  ;;  %p624_p12 = scmp.lt.s32.totalorder %s618_s22, %s618_s22 }
  0x48   :  { %502 = vmatpush3.bf16.msra.mxu1 %v501_v17  ;;  %p625_p13 = por %p624_p12, %p623_p11 }
  0x49   :  { %503 = vmatprep.subr.bf16.mxu1 %v649_v0  ;;  %523 = vmatpush3.bf16.msra.mxu0 %v522_v38 }
  0x4a   :  { %524 = vmatprep.subr.bf16.mxu0 %v649_v0  ;;  %p626_p0 = pnand %p625_p13, %p619_p10 }
  0x4c   :  { %505 = vmatpush3.bf16.msra.mxu1 %v504_v20 }
  0x4d   :  { %506 = vmatprep.subr.bf16.mxu1 %v649_v0  ;;  %526 = vmatpush3.bf16.msra.mxu0 %v525_v41 }
  0x4e   :  { %527 = vmatprep.subr.bf16.mxu0 %v649_v0 }
  0x50   :  { %508 = vmatpush3.bf16.msra.mxu1 %v507_v23 }
  0x51   :  { %509 = vmatprep.subr.bf16.mxu1 %v649_v0  ;;  %529 = vmatpush3.bf16.msra.mxu0 %v528_v44 }
  0x52   :  { %530 = vmatprep.subr.bf16.mxu0 %v649_v0 }
  0x54   :  { %511 = vmatpush3.bf16.msra.mxu1 %v510_v26 }
  0x55   :  { %512 = vmatprep.subr.bf16.mxu1 %v649_v0  ;;  %532 = vmatpush3.bf16.msra.mxu0 %v531_v52 }
  0x56   :  { %533 = vmatprep.subr.bf16.mxu0 %v649_v0 }
  0x58   :  { %514 = vmatpush3.bf16.msra.mxu1 %v513_v29 }
  0x59   :  { %535 = vmatpush3.bf16.msra.mxu0 %v534_v55 }
  0x5a   :  { %536 = vmatprep.subr.bf16.mxu0 %v649_v0  ;;  %v343_v0 = vld [vmem:[%s890_s8] sm:$0xff] }
  0x5d   :  { %538 = vmatpush3.bf16.msra.mxu0 %v537_v58 }
 0x111   :  { %v148_v46 = vpop.f32.mrb[0].mxu0 }
 0x112   :  { %v149_v47 = vadd.f32 %v370_v45, %v148_v46  ;;  %v417_v48 = vpop.f32.mrb[1].mxu0 }
 0x114   :  { %546 = vtanh.f32 %v149_v47 }
 0x11e   :  { %v547_v49 = vpop.eup %546 }
 0x11f   :  { %451 = vmatmul.mubr.f32.vlgmr.msra.gmra.mrb[0].mxu1 %v547_v49 }
 0x1f2   :  { %v242_v60 = vpop.f32.mrb[0].mxu1 }
 0x1f3   :  { %v243_v61 = vadd.f32 %v372_v59, %v242_v60  ;;  %v452_v62 = vpop.f32.mrb[1].mxu1 }
 0x1f5   :  { %548 = vtanh.f32 %v243_v61 }
 0x1f6   :  { %550 = vpow2.f32 %v341_v2 }
 0x1ff   :  { %v549_v63 = vpop.eup %548 }
 0x200   :  { %486 = vmatmul.mubr.f32.vlgmr.msra.gmra.mrb[2].mxu0 %v549_v63  ;;  %v551_v6 = vpop.eup %550 }
 0x201   :  { %v348_v7 = vrot.slane %v551_v6, %v347_v5 }
 0x203   :  { %v350_v9 = vmul.f32 %v348_v7, %v343_v0 }
 0x2d3   :  { %v336_v10 = vpop.f32.mrb[2].mxu0 }
 0x2d4   :  { %v337_v11 = vadd.f32 %v373_v8, %v336_v10  ;;  %v487_v12 = vpop.f32.mrb[3].mxu0 }
 0x2d6   :  { %v351_v13 = vadd.f32 %v350_v9, %v337_v11 }
 0x2d8   :  { %353 = vst.msk [vmem:[#allocation8] sm:$0xff] %vm352_vm2, %v351_v13 }
 0x2d9   :  { %629 = shalt.err (!%p626_p0)
}
 0x2da   :  { %s630_s12 = scalar_lea.hbm %s891_s9, 128 }
 0x2db   :  { %p631_p1 = scmp.ne.s32.totalorder %s891_s9, %s630_s12  ;;  %p634_p2 = scmp.lt.u32.totalorder %s630_s12, %s891_s9 }
 0x2dd   :  { %p636_p3 = pnand %p634_p2, %p631_p1 }
 0x2df   :  { %639 = shalt.err (!%p636_p3)
}
 0x2e0   :  { %363 = dma.vmem_to_hbm [thread:$0]  %s361_s21, 128, %s891_s9, [#allocation4]  }
 0x2e1   :  { %644 = dma.done.wait [#allocation4], 128  }
 0x2e2   :  { %645 = vsyncadd [#allocation4], 4294967168 }
 0x2e3   :  { %367 = vsyncpa [#allocation3], 1 }
 0x2e4   :  { %368 = vsyncpa [#allocation6], 1 }
 0x2e5   :  { %369 = vsyncpa [#allocation4], 1 }

</bundles_post_ra>
